<compile_context>
chip_gen: v5e
topology: v5e:2x2
jax: 0.10.0
libtpu: 0.0.40
codegen_flags: <defaults>
</compile_context>

<pallas_src>
import jax
import jax.numpy as jnp
from jax.experimental import pallas as pl
from jax.experimental.pallas import tpu as pltpu

_LANE = 128
_BN_EPS = 1e-5


def _round_up(x, m):
    return (x + m - 1) // m * m


def _fold_bn(w, b, gamma, beta, mean, var, eps=_BN_EPS):
    """Fold eval-mode BatchNorm1d into the preceding Linear (f32)."""
    scale = gamma * jax.lax.rsqrt(var + eps)          # (1, C_out)
    w_f = w * scale                                   # (C_in, C_out)
    b_f = (b - mean) * scale + beta                   # (1, C_out)
    return w_f, b_f


# ---------------------------------------------------------------------------
# Kernel
# ---------------------------------------------------------------------------
def _cls_head_kernel(x_ref, w_ref, b_ref, o_ref):
    # x_ref : (tile_B, PAD)  bf16   activations (zero-padded lanes)
    # w_ref : (3, PAD, PAD)  bf16   BN-folded, zero-padded weights, resident
    # b_ref : (3, PAD)       f32    BN-folded, zero-padded biases
    # o_ref : (tile_B, PAD)  f32    lane-dense logits (padded columns are 0)
    x = x_ref[...]

    # ---- Linear1 (+ folded BN) + ReLU  (dropout = identity, eval mode) ----
    h = jnp.dot(x, w_ref[0], preferred_element_type=jnp.float32) + b_ref[0:1, :]
    h = jnp.maximum(h, 0.0)

    # ---- Linear2 (+ folded BN) + ReLU ----
    h = jnp.dot(h.astype(jnp.bfloat16), w_ref[1],
                preferred_element_type=jnp.float32) + b_ref[1:2, :]
    h = jnp.maximum(h, 0.0)

    # ---- Final Linear (logits) ----
    logits = jnp.dot(h.astype(jnp.bfloat16), w_ref[2],
                     preferred_element_type=jnp.float32) + b_ref[2:3, :]
    o_ref[...] = logits


# ---------------------------------------------------------------------------
# Host-side param preparation: fold BN, zero-pad to lane width, pack.
# ---------------------------------------------------------------------------
def prepare_params(params):
    (w1, b1, g1, be1, m1, v1,
     w2, b2, g2, be2, m2, v2,
     w3, b3) = params

    w1f, b1f = _fold_bn(w1, b1, g1, be1, m1, v1)
    w2f, b2f = _fold_bn(w2, b2, g2, be2, m2, v2)
    w3f, b3f = w3, b3

    dims = (w1.shape[0], w1.shape[1], w2.shape[1], w3.shape[1])
    pad = max(_round_up(d, _LANE) for d in dims)

    def pad_w(w):
        out = jnp.zeros((pad, pad), jnp.float32)
        return out.at[: w.shape[0], : w.shape[1]].set(w)

    def pad_b(b):
        out = jnp.zeros((pad,), jnp.float32)
        return out.at[: b.shape[1]].set(b[0])

    w_packed = jnp.stack([pad_w(w1f), pad_w(w2f), pad_w(w3f)]).astype(jnp.bfloat16)
    b_packed = jnp.stack([pad_b(b1f), pad_b(b2f), pad_b(b3f)])  # (3, pad) f32
    return w_packed, b_packed, pad, dims


# ---------------------------------------------------------------------------
# Wrapper
# ---------------------------------------------------------------------------
def cls_head_forward(x, params):
    """x: (B, in_channels) float32. Returns logits (B, num_classes) float32."""
    w_packed, b_packed, pad, dims = prepare_params(params)
    B = x.shape[0]
    in_channels, num_classes = dims[0], dims[3]

    # Batch tiling: parallel grid axis (uses both TCs on v7x); tile capped at
    # 512 rows so double-buffered tiles + resident weights fit v7x VMEM.
    tile_b = min(512, _round_up(B, 8))
    b_pad = _round_up(B, tile_b)
    grid = (b_pad // tile_b,)

    x_p = jnp.zeros((b_pad, pad), jnp.bfloat16)
    x_p = x_p.at[:B, :in_channels].set(x.astype(jnp.bfloat16))

    out = pl.pallas_call(
        _cls_head_kernel,
        out_shape=jax.ShapeDtypeStruct((b_pad, pad), jnp.float32),
        grid_spec=pltpu.PrefetchScalarGridSpec(
            num_scalar_prefetch=0,
            grid=grid,
            in_specs=[
                pl.BlockSpec((tile_b, pad), lambda i: (i, 0)),       # x tile
                pl.BlockSpec((3, pad, pad), lambda i: (0, 0, 0)),    # weights (resident)
                pl.BlockSpec((3, pad), lambda i: (0, 0)),            # biases (resident)
            ],
            out_specs=pl.BlockSpec((tile_b, pad), lambda i: (i, 0)),
        ),
        compiler_params=pltpu.CompilerParams(
            dimension_semantics=("parallel",)),
    )(x_p, w_packed, b_packed)

    return out[:B, :num_classes]


# ---------------------------------------------------------------------------
# Deterministic parameter init (nn.Linear / nn.BatchNorm1d shapes)
# ---------------------------------------------------------------------------
def init_params(key, in_channels, mlps, num_classes):
    dims = [in_channels] + mlps + [num_classes]
    keys = jax.random.split(key, 16)
    ki = iter(range(16))

    def linear(fan_in, fan_out):
        bound = 1.0 / (fan_in ** 0.5)
        w = jax.random.uniform(keys[next(ki)], (fan_in, fan_out),
                               jnp.float32, -bound, bound)
        b = jax.random.uniform(keys[next(ki)], (1, fan_out),
                               jnp.float32, -bound, bound)
        return w, b

    def bn(c):
        g = jax.random.uniform(keys[next(ki)], (1, c), jnp.float32, 0.5, 1.5)
        be = jax.random.uniform(keys[next(ki)], (1, c), jnp.float32, -0.5, 0.5)
        m = jax.random.uniform(keys[next(ki)], (1, c), jnp.float32, -0.5, 0.5)
        v = jax.random.uniform(keys[next(ki)], (1, c), jnp.float32, 0.5, 1.5)
        return g, be, m, v

    w1, b1 = linear(dims[0], dims[1])
    g1, be1, m1, v1 = bn(dims[1])
    w2, b2 = linear(dims[1], dims[2])
    g2, be2, m2, v2 = bn(dims[2])
    w3, b3 = linear(dims[2], dims[3])

    return (w1, b1, g1, be1, m1, v1,
            w2, b2, g2, be2, m2, v2,
            w3, b3)


def reference_forward(x, params):
    """Pure-JAX eval-mode reference, matching the kernel's bf16 MXU inputs."""
    (w1, b1, g1, be1, m1, v1,
     w2, b2, g2, be2, m2, v2,
     w3, b3) = params
    w1f, b1f = _fold_bn(w1, b1, g1, be1, m1, v1)
    w2f, b2f = _fold_bn(w2, b2, g2, be2, m2, v2)
    bf = jnp.bfloat16
    h = jnp.dot(x.astype(bf), w1f.astype(bf),
                preferred_element_type=jnp.float32) + b1f
    h = jnp.maximum(h, 0.0)
    h = jnp.dot(h.astype(bf), w2f.astype(bf),
                preferred_element_type=jnp.float32) + b2f
    h = jnp.maximum(h, 0.0)
    return jnp.dot(h.astype(bf), w3.astype(bf),
                   preferred_element_type=jnp.float32) + b3


if __name__ == "__main__":
    # Small shapes consistent with the module structure:
    #   in_channels=32, mlps=[64, 64], num_classes=16, batch=8.
    B, in_channels, mlps, num_classes = 8, 32, [64, 64], 16

    key = jax.random.PRNGKey(0)
    k_x, k_p = jax.random.split(key)
    x = jax.random.normal(k_x, (B, in_channels), jnp.float32)
    params = init_params(k_p, in_channels, mlps, num_classes)

    logits = cls_head_forward(x, params)
    logits = jax.block_until_ready(logits)

    ref = reference_forward(x, params)
    assert logits.shape == (B, num_classes)
    assert jnp.allclose(logits, ref, atol=1e-2, rtol=1e-2), "mismatch vs reference"

    print("KERNEL_OK")
</pallas_src>

<mosaic_0001>
module attributes {stable_mosaic.version = 11 : i64} {
  func.func @_cls_head_kernel(%arg0: i32, %arg1: memref<8x128xbf16, #tpu.memory_space<vmem>>, %arg2: memref<3x128x128xbf16, #tpu.memory_space<vmem>>, %arg3: memref<3x128xf32, #tpu.memory_space<vmem>>, %arg4: memref<8x128xf32, #tpu.memory_space<vmem>>) attributes {dimension_semantics = [#tpu.dimension_semantics<parallel>], iteration_bounds = array<i64: 1>, scalar_prefetch = 0 : i64, scratch_operands = 0 : i64, tpu.core_type = #tpu.core_type<tc>, window_params = [{transform_indices = @transform_0, window_bounds = array<i64: 8, 128>}, {pipeline_mode = #tpu.pipeline_mode<synchronous>, transform_indices = @transform_1, window_bounds = array<i64: 3, 128, 128>}, {pipeline_mode = #tpu.pipeline_mode<synchronous>, transform_indices = @transform_2, window_bounds = array<i64: 3, 128>}, {transform_indices = @transform_3, window_bounds = array<i64: 8, 128>}]} {
    %c0 = arith.constant 0 : index
    %c0_0 = arith.constant 0 : index
    %0 = vector.load %arg1[%c0, %c0_0] : memref<8x128xbf16, #tpu.memory_space<vmem>>, vector<8x128xbf16>
    %c0_1 = arith.constant 0 : index
    %c0_2 = arith.constant 0 : index
    %c0_3 = arith.constant 0 : index
    %1 = vector.load %arg2[%c0_1, %c0_2, %c0_3] : memref<3x128x128xbf16, #tpu.memory_space<vmem>>, vector<1x128x128xbf16>
    %2 = vector.shape_cast %1 : vector<1x128x128xbf16> to vector<128x128xbf16>
    %cst = arith.constant dense<0.000000e+00> : vector<8x128xf32>
    %3 = tpu.matmul %0, %2, %cst {dimension_numbers = #tpu.dot_dimension_numbers<[1], [0], [0], [1], [0, 0, 1, 1], [], []>} : vector<8x128xbf16>, vector<128x128xbf16>, vector<8x128xf32> -> vector<8x128xf32>
    %c0_4 = arith.constant 0 : index
    %c0_5 = arith.constant 0 : index
    %4 = vector.load %arg3[%c0_4, %c0_5] : memref<3x128xf32, #tpu.memory_space<vmem>>, vector<1x128xf32>
    %5 = vector.broadcast %4 : vector<1x128xf32> to vector<8x128xf32>
    %6 = arith.addf %3, %5 : vector<8x128xf32>
    %cst_6 = arith.constant 0.000000e+00 : f32
    %7 = vector.broadcast %cst_6 : f32 to vector<8x128xf32>
    %8 = arith.maximumf %6, %7 : vector<8x128xf32>
    %9 = arith.truncf %8 : vector<8x128xf32> to vector<8x128xbf16>
    %c1 = arith.constant 1 : index
    %c0_7 = arith.constant 0 : index
    %c0_8 = arith.constant 0 : index
    %10 = vector.load %arg2[%c1, %c0_7, %c0_8] : memref<3x128x128xbf16, #tpu.memory_space<vmem>>, vector<1x128x128xbf16>
    %11 = vector.shape_cast %10 : vector<1x128x128xbf16> to vector<128x128xbf16>
    %cst_9 = arith.constant dense<0.000000e+00> : vector<8x128xf32>
    %12 = tpu.matmul %9, %11, %cst_9 {dimension_numbers = #tpu.dot_dimension_numbers<[1], [0], [0], [1], [0, 0, 1, 1], [], []>} : vector<8x128xbf16>, vector<128x128xbf16>, vector<8x128xf32> -> vector<8x128xf32>
    %c1_10 = arith.constant 1 : index
    %c0_11 = arith.constant 0 : index
    %13 = vector.load %arg3[%c1_10, %c0_11] : memref<3x128xf32, #tpu.memory_space<vmem>>, vector<1x128xf32>
    %14 = vector.broadcast %13 : vector<1x128xf32> to vector<8x128xf32>
    %15 = arith.addf %12, %14 : vector<8x128xf32>
    %cst_12 = arith.constant 0.000000e+00 : f32
    %16 = vector.broadcast %cst_12 : f32 to vector<8x128xf32>
    %17 = arith.maximumf %15, %16 : vector<8x128xf32>
    %18 = arith.truncf %17 : vector<8x128xf32> to vector<8x128xbf16>
    %c2 = arith.constant 2 : index
    %c0_13 = arith.constant 0 : index
    %c0_14 = arith.constant 0 : index
    %19 = vector.load %arg2[%c2, %c0_13, %c0_14] : memref<3x128x128xbf16, #tpu.memory_space<vmem>>, vector<1x128x128xbf16>
    %20 = vector.shape_cast %19 : vector<1x128x128xbf16> to vector<128x128xbf16>
    %cst_15 = arith.constant dense<0.000000e+00> : vector<8x128xf32>
    %21 = tpu.matmul %18, %20, %cst_15 {dimension_numbers = #tpu.dot_dimension_numbers<[1], [0], [0], [1], [0, 0, 1, 1], [], []>} : vector<8x128xbf16>, vector<128x128xbf16>, vector<8x128xf32> -> vector<8x128xf32>
    %c2_16 = arith.constant 2 : index
    %c0_17 = arith.constant 0 : index
    %22 = vector.load %arg3[%c2_16, %c0_17] : memref<3x128xf32, #tpu.memory_space<vmem>>, vector<1x128xf32>
    %23 = vector.broadcast %22 : vector<1x128xf32> to vector<8x128xf32>
    %24 = arith.addf %21, %23 : vector<8x128xf32>
    %c0_18 = arith.constant 0 : index
    %c0_19 = arith.constant 0 : index
    %25 = vector.load %arg4[%c0_18, %c0_19] : memref<8x128xf32, #tpu.memory_space<vmem>>, vector<8x128xf32>
    tpu.vector_store %arg4[%c0_18, %c0_19], %24 {strides = array<i32>} : memref<8x128xf32, #tpu.memory_space<vmem>>, vector<8x128xf32>,
    return
  }
  func.func @transform_0(%arg0: i32) -> (i32, i32) {
    %c0_i32 = arith.constant 0 : i32
    %c0_i32_0 = arith.constant 0 : i32
    return %arg0, %c0_i32 : i32, i32
  }
  func.func @transform_1(%arg0: i32) -> (i32, i32, i32) {
    %c0_i32 = arith.constant 0 : i32
    %c0_i32_0 = arith.constant 0 : i32
    %c0_i32_1 = arith.constant 0 : i32
    %c0_i32_2 = arith.constant 0 : i32
    return %c0_i32, %c0_i32_0, %c0_i32_1 : i32, i32, i32
  }
  func.func @transform_2(%arg0: i32) -> (i32, i32) {
    %c0_i32 = arith.constant 0 : i32
    %c0_i32_0 = arith.constant 0 : i32
    %c0_i32_1 = arith.constant 0 : i32
    return %c0_i32, %c0_i32_0 : i32, i32
  }
  func.func @transform_3(%arg0: i32) -> (i32, i32) {
    %c0_i32 = arith.constant 0 : i32
    %c0_i32_0 = arith.constant 0 : i32
    return %arg0, %c0_i32 : i32, i32
  }
}

</mosaic_0001>

<bundles_post_ra>
// kernel: tpu_custom_call.1
= control target key start
LH: loop header
LB: loop body
LE: loop exit
PB: predicated region body
PF: predicated region fallthrough
CT: control target
= control target key end

     0   :  { %8 = vsyncpa [#allocation3], 0  ;;  %s590_s0 = inlined_call_operand.hbm [shape: bf16[8,128], index: 0, kind: input, shape index: {}]   ;;  %s591_s1 = inlined_call_operand.hbm [shape: bf16[3,128,128], index: 1, kind: input, shape index: {}]   ;;  %s592_s2 = inlined_call_operand.hbm [shape: f32[3,128], index: 2, kind: input, shape index: {}]   ;;  %s593_s3 = inlined_call_operand.hbm [shape: f32[8,128], index: 3, kind: output, shape index: {}]  }
   0x1   :  { %9 = vsyncpa [#allocation6], 0  ;;  %s26_s14 = sshll.u32 %s591_s1, 4  ;;  %s27_s14 = int_to_ptr.hbm [resolvable:$true] %s26_s14 }
   0x2   :  { %10 = vsyncpa [#allocation4], 0  ;;  %s552_s15 = smov [#allocation5]   ;;  %s16_s19 = sshll.u32 %s590_s0, 4  ;;  %s17_s19 = int_to_ptr.hbm [resolvable:$true] %s16_s19 }
   0x3   :  { %s28_s16 = sshll.u32 %s552_s15, 4  ;;  %s553_s20 = smov 64   ;;  %s29_s16 = int_to_ptr.vmem [resolvable:$true] %s28_s16 }
   0x4   :  { %s554_s21 = smov 4   ;;  %s555_s22 = smov [#allocation2]  }
   0x5   :  { %34 = dma.hbm_to_vmem [thread:$0]  %s27_s14, 3072, %s29_s16, [#allocation6], %s553_s20, %s553_s20, %s554_s21  }
   0x6   :  { %s18_s23 = sshll.u32 %s555_s22, 4  ;;  %s40_s26 = sshll.u32 %s592_s2, 4  ;;  %s19_s23 = int_to_ptr.vmem [resolvable:$true] %s18_s23  ;;  %s41_s26 = int_to_ptr.hbm [resolvable:$true] %s40_s26 }
   0x7   :  { %21 = dma.hbm_to_vmem [thread:$0]  %s17_s19, 64, %s19_s23, [#allocation3]  }
   0x8   :  { %s556_s1 = smov [#allocation7]  }
   0x9   :  { %s42_s27 = sshll.u32 %s556_s1, 4  ;;  %s43_s27 = int_to_ptr.vmem [resolvable:$true] %s42_s27 }
   0xa   :  { %45 = dma.hbm_to_vmem [thread:$0]  %s41_s26, 64, %s43_s27, [#allocation6]  }
   0xb   :  { %546 = dma.done.wait [#allocation3], 64  }
   0xc   :  { %547 = vsyncadd [#allocation3], 4294967232 }
   0xd   :  { %548 = dma.done.wait [#allocation6], 3136  }
   0xe   :  { %549 = vsyncadd [#allocation6], 4294964160  ;;  %v424_v0 = vld [vmem:[#allocation5 + $0x38] sm:$0xff]  ;;  %v423_v1 = vld [vmem:[#allocation5 + $0x30] sm:$0xff]  ;;  %s557_s0 = smov [#allocation8]   ;;  %s310_s30 = sshll.u32 %s593_s3, 4  ;;  %s311_s30 = int_to_ptr.hbm [resolvable:$true] %s310_s30 }
   0xf   :  { %125 = vmatpush.bf16.msra.mxu0 %v424_v0  ;;  %v432_v2 = vld [vmem:[#allocation5 + $0x78] sm:$0xff]  ;;  %v431_v3 = vld [vmem:[#allocation5 + $0x70] sm:$0xff]  ;;  %v422_v4 = vld [vmem:[#allocation5 + $0x28] sm:$0xff]  ;;  %s308_s2 = sshll.u32 %s557_s0, 4  ;;  %s309_s2 = int_to_ptr.vmem [resolvable:$true] %s308_s2 }
  0x10   :  { %207 = vmatpush.bf16.msra.mxu1 %v432_v2  ;;  %v430_v5 = vld [vmem:[#allocation5 + $0x68] sm:$0xff]  ;;  %v421_v6 = vld [vmem:[#allocation5 + $0x20] sm:$0xff]  ;;  %v420_v8 = vld [vmem:[#allocation5 + $0x18] sm:$0xff] }
  0x11   :  { %v429_v7 = vld [vmem:[#allocation5 + $0x60] sm:$0xff]  ;;  %v428_v9 = vld [vmem:[#allocation5 + $0x58] sm:$0xff]  ;;  %v419_v10 = vld [vmem:[#allocation5 + $0x10] sm:$0xff] }
  0x12   :  { %v427_v11 = vld [vmem:[#allocation5 + $0x50] sm:$0xff]  ;;  %v418_v12 = vld [vmem:[#allocation5 + $0x8] sm:$0xff]  ;;  %v417_v13 = vld [vmem:[#allocation5] sm:$0xff] }
  0x13   :  { %126 = vmatpush.bf16.msra.mxu0 %v423_v1  ;;  %v58_v14 = vld [vmem:[#allocation2] sm:$0xf]  ;;  %v426_v15 = vld [vmem:[#allocation5 + $0x48] sm:$0xff]  ;;  %v425_v16 = vld [vmem:[#allocation5 + $0x40] sm:$0xff] }
  0x14   :  { %208 = vmatpush.bf16.msra.mxu1 %v431_v3  ;;  %v440_v17 = vld [vmem:[#allocation5 + $0xb8] sm:$0xff]  ;;  %v439_v18 = vld [vmem:[#allocation5 + $0xb0] sm:$0xff]  ;;  %v438_v19 = vld [vmem:[#allocation5 + $0xa8] sm:$0xff] }
  0x15   :  { %289 = vmatpush.bf16.msra.mxu2 %v440_v17  ;;  %v437_v20 = vld [vmem:[#allocation5 + $0xa0] sm:$0xff]  ;;  %v436_v21 = vld [vmem:[#allocation5 + $0x98] sm:$0xff]  ;;  %v435_v22 = vld [vmem:[#allocation5 + $0x90] sm:$0xff] }
  0x16   :  { %v447_v23 = vld [vmem:[#allocation7] ss:$0 sm:$0xff]  ;;  %v434_v29 = vld [vmem:[#allocation5 + $0x88] sm:$0xff]  ;;  %v448_v31 = vld [vmem:[#allocation7 + $0x1] ss:$0 sm:$0xff] }
  0x17   :  { %127 = vmatpush.bf16.msra.mxu0 %v422_v4  ;;  %v433_v30 = vld [vmem:[#allocation5 + $0x80] sm:$0xff] }
  0x18   :  { %209 = vmatpush.bf16.msra.mxu1 %v430_v5  ;;  %v449_v37 = vld [vmem:[#allocation7 + $0x2] ss:$0 sm:$0xff] }
  0x19   :  { %290 = vmatpush.bf16.msra.mxu2 %v439_v18 }
  0x1b   :  { %128 = vmatpush.bf16.msra.mxu0 %v421_v6 }
  0x1c   :  { %210 = vmatpush.bf16.msra.mxu1 %v429_v7 }
  0x1d   :  { %291 = vmatpush.bf16.msra.mxu2 %v438_v19 }
  0x1f   :  { %129 = vmatpush.bf16.msra.mxu0 %v420_v8 }
  0x20   :  { %211 = vmatpush.bf16.msra.mxu1 %v428_v9 }
  0x21   :  { %292 = vmatpush.bf16.msra.mxu2 %v437_v20 }
  0x23   :  { %130 = vmatpush.bf16.msra.mxu0 %v419_v10 }
  0x24   :  { %212 = vmatpush.bf16.msra.mxu1 %v427_v11 }
  0x25   :  { %293 = vmatpush.bf16.msra.mxu2 %v436_v21 }
  0x27   :  { %131 = vmatpush.bf16.msra.mxu0 %v418_v12 }
  0x28   :  { %213 = vmatpush.bf16.msra.mxu1 %v426_v15 }
  0x29   :  { %294 = vmatpush.bf16.msra.mxu2 %v435_v22 }
  0x2b   :  { %132 = vmatpush.bf16.msra.mxu0 %v417_v13 }
  0x2c   :  { %214 = vmatpush.bf16.msra.mxu1 %v425_v16 }
  0x2d   :  { %295 = vmatpush.bf16.msra.mxu2 %v434_v29 }
  0x2e   :  { %133 = vmatmul.bf16.vlgmr.msra.gmra.mxu0 %v58_v14 }
  0x31   :  { %296 = vmatpush.bf16.msra.mxu2 %v433_v30 }
  0xab   :  { %v134_v24 = vpop.f32.mrf.mxu0 }
  0xac   :  { %v135_v25 = vadd.f32 %v447_v23, %v134_v24 }
  0xae   :  { %v138_v26 = vmax.f32 %v135_v25, 0.0 }
  0xb0   :  { %v139_v27 = vpack.c.bf16 %v138_v26, %v138_v26 }
  0xb2   :  { %215 = vmatmul.bf16.vlgmr.msra.gmra.mxu1 %v139_v27 }
  0xb3   :  { %v136_v28 = vpop.f32.mrf.mxu0 }
 0x12f   :  { %v216_v32 = vpop.f32.mrf.mxu1 }
 0x130   :  { %v217_v33 = vadd.f32 %v448_v31, %v216_v32 }
 0x132   :  { %v220_v34 = vmax.f32 %v217_v33, 0.0 }
 0x134   :  { %v221_v35 = vpack.c.bf16 %v220_v34, %v220_v34 }
 0x136   :  { %297 = vmatmul.bf16.vlgmr.msra.gmra.mxu2 %v221_v35 }
 0x137   :  { %v218_v36 = vpop.f32.mrf.mxu1 }
 0x1b9   :  { %v298_v38 = vpop.f32.mrf.mxu2 }
 0x1ba   :  { %v299_v39 = vadd.f32 %v449_v37, %v298_v38 }
 0x1bc   :  { %302 = vst [vmem:[#allocation8] sm:$0xff] %v299_v39 }
 0x1bd   :  { %313 = dma.vmem_to_hbm [thread:$0]  %s309_s2, 128, %s311_s30, [#allocation4]  }
 0x1c1   :  { %v300_v40 = vpop.f32.mrf.mxu2 }
 0x1c2   :  { %550 = dma.done.wait [#allocation4], 128  }
 0x1c3   :  { %551 = vsyncadd [#allocation4], 4294967168 }
 0x1c4   :  { %318 = vsyncpa [#allocation3], 1 }
 0x1c5   :  { %319 = vsyncpa [#allocation6], 1 }
 0x1c6   :  { %320 = vsyncpa [#allocation4], 1 }

</bundles_post_ra>
